<compile_context>
chip_gen: v5e
topology: v5e:2x2
jax: 0.10.0
libtpu: 0.0.40
codegen_flags: <defaults>
</compile_context>

<pallas_src>
import functools
import math

import jax
import jax.numpy as jnp
from jax.experimental import pallas as pl
from jax.experimental.pallas import tpu as pltpu


def _round_up(n, m):
    return ((n + m - 1) // m) * m


def _conformal_attention_kernel(*refs, dp, has_mask, compute_dtype):
    """One grid step == one batch element. All tensors are 2-D inside."""
    if has_mask:
        (x_ref, mask_ref, wqkv_ref, bqkv_ref, wo_ref, bo_ref,
         out_ref, attn_ref) = refs
    else:
        (x_ref, wqkv_ref, bqkv_ref, wo_ref, bo_ref,
         out_ref, attn_ref) = refs
        mask_ref = None

    # x block is (1, S, D); [0] drops the leading size-1 axis (no reshape).
    x = x_ref[0].astype(compute_dtype)                                 # (S, D)

    # Fused Q|K|V projection. Each projection occupies its own 128-aligned
    # dp-wide column block; the conformal scale is pre-folded into Wq / bq.
    qkv = jnp.dot(x, wqkv_ref[...], preferred_element_type=jnp.float32)
    qkv = qkv + bqkv_ref[...]                                          # (S, 3*dp) f32

    # Tile-aligned lane slices (offsets are multiples of 128) -> free.
    q = qkv[:, 0 * dp:1 * dp].astype(compute_dtype)                    # (S, dp)
    k = qkv[:, 1 * dp:2 * dp].astype(compute_dtype)                    # (S, dp)
    v = qkv[:, 2 * dp:3 * dp].astype(compute_dtype)                    # (S, dp)

    # q · k^T contracting the last dim of both (no explicit transpose);
    # padded lanes of q/k are zero so they contribute nothing.
    scores = jax.lax.dot_general(
        q, k, (((1,), (1,)), ((), ())),
        preferred_element_type=jnp.float32)                            # (S, S) f32
    if has_mask:
        scores = scores + mask_ref[0]

    # Numerically stable, exact softmax (f32 VPU/EUP math; v5e-safe).
    m = jnp.max(scores, axis=-1, keepdims=True)
    p = jnp.exp(scores - m)
    denom = jnp.sum(p, axis=-1, keepdims=True)
    attn = p / denom
    # NOTE: a fully-masked row (denom == 0) yields NaN, exactly like a plain
    # softmax; callers must keep at least one unmasked key per query.

    ctx = jnp.dot(attn.astype(compute_dtype), v,
                  preferred_element_type=jnp.float32)                  # (S, dp)

    # Output projection into a lane-dense (S, dp) slab (Wo zero-padded on the
    # host so padded ctx lanes hit zero rows) -> full-width unmasked stores.
    y = jnp.dot(ctx.astype(compute_dtype), wo_ref[...],
                preferred_element_type=jnp.float32) + bo_ref[...]      # (S, dp)

    out_ref[0] = y.astype(out_ref.dtype)
    attn_ref[0] = attn.astype(attn_ref.dtype)


def prepare_params(params, *, hyperbolic_scale=1.0, temperature=1.0,
                   compute_dtype=jnp.bfloat16):
    """One-time host-side packing (hoisted out of the per-call wrapper).

    * folds the conformal scale into Wq / bq,
    * fuses Q|K|V into one (D, 3*dp) weight with each projection padded to its
      own 128-lane-aligned dp-wide column block,
    * zero-pads Wo (rows and cols) / bo so the kernel's output slab is
      lane-dense and the padded ctx lanes are annihilated.
    """
    wq, bq, wk, bk, wv, bv, wo, bo = params
    D = wq.shape[0]
    scale = float(hyperbolic_scale) / (math.sqrt(D) * float(temperature))
    dp = _round_up(D, 128)
    pad_c = ((0, 0), (0, dp - D))

    wqkv_p = jnp.concatenate(
        [jnp.pad(wq * scale, pad_c), jnp.pad(wk, pad_c), jnp.pad(wv, pad_c)],
        axis=1).astype(compute_dtype)                                  # (D, 3*dp)
    bqkv_p = jnp.concatenate(
        [jnp.pad(bq * scale, (0, dp - D)),
         jnp.pad(bk, (0, dp - D)),
         jnp.pad(bv, (0, dp - D))]).reshape(1, 3 * dp).astype(jnp.float32)
    wo_p = jnp.pad(wo, ((0, dp - D), (0, dp - D))).astype(compute_dtype)  # (dp, dp)
    bo_p = jnp.pad(bo, (0, dp - D)).reshape(1, dp).astype(jnp.float32)

    return {"wqkv": wqkv_p, "bqkv": bqkv_p, "wo": wo_p, "bo": bo_p,
            "dim": D, "dp": dp, "compute_dtype": compute_dtype}


def standardized_attention(x, mask, packed):
    """CONFORMAL StandardizedAttention forward.

    x: [B, S, D] float32; mask: optional additive bias broadcastable to
    [B, S, S] (0 keep, -inf-like drop). Returns (output [B, S, D] f32,
    {"attention_weights": [B, S, S] f32}) like the PyTorch module.
    """
    B, S, D = x.shape
    assert packed["dim"] == D, "packed params built for a different dim"
    dp = packed["dp"]
    cd = packed["compute_dtype"]
    has_mask = mask is not None

    kernel = functools.partial(_conformal_attention_kernel,
                               dp=dp, has_mask=has_mask, compute_dtype=cd)

    inputs = [x]
    in_specs = [pl.BlockSpec((1, S, D), lambda b: (b, 0, 0))]
    if has_mask:
        mask = jnp.broadcast_to(mask, (B, S, S))
        if not jnp.issubdtype(mask.dtype, jnp.floating):
            mask = mask.astype(jnp.float32)
        inputs.append(mask)
        in_specs.append(pl.BlockSpec((1, S, S), lambda b: (b, 0, 0)))
    inputs += [packed["wqkv"], packed["bqkv"], packed["wo"], packed["bo"]]
    in_specs += [
        pl.BlockSpec((D, 3 * dp), lambda b: (0, 0)),
        pl.BlockSpec((1, 3 * dp), lambda b: (0, 0)),
        pl.BlockSpec((dp, dp), lambda b: (0, 0)),
        pl.BlockSpec((1, dp), lambda b: (0, 0)),
    ]

    # Per-step block footprint (x2 for double buffering) plus headroom,
    # clamped to stay inside every generation's scoped-VMEM budget.
    mask_bytes = S * S * (mask.dtype.itemsize if has_mask else 0)
    blk_bytes = (S * D * 4 + mask_bytes
                 + D * 3 * dp * 2 + 3 * dp * 4 + dp * dp * 2 + dp * 4
                 + S * dp * 4 + S * S * 4)
    vmem_limit = int(min(max(4 * blk_bytes + (4 << 20), 8 << 20), 64 << 20))

    out_p, attn = pl.pallas_call(
        kernel,
        out_shape=(
            jax.ShapeDtypeStruct((B, S, dp), jnp.float32),  # lane-dense slab
            jax.ShapeDtypeStruct((B, S, S), jnp.float32),   # attention weights
        ),
        grid_spec=pltpu.PrefetchScalarGridSpec(
            num_scalar_prefetch=0,
            grid=(B,),   # one batch element per step; "parallel" for megacore
            in_specs=in_specs,
            out_specs=[
                pl.BlockSpec((1, S, dp), lambda b: (b, 0, 0)),
                pl.BlockSpec((1, S, S), lambda b: (b, 0, 0)),
            ],
        ),
        compiler_params=pltpu.CompilerParams(
            dimension_semantics=("parallel",),
            vmem_limit_bytes=vmem_limit),
    )(*inputs)

    out = out_p[:, :, :D] if dp != D else out_p   # no-op when D % 128 == 0
    return out, {"attention_weights": attn}


def init_params(key, dim):
    """Deterministic nn.Linear-style init for Q/K/V/O projections."""
    keys = jax.random.split(key, 8)
    bound = 1.0 / math.sqrt(dim)

    def lin(kw, kb):
        w = jax.random.uniform(kw, (dim, dim), jnp.float32, -bound, bound)
        b = jax.random.uniform(kb, (dim,), jnp.float32, -bound, bound)
        return w, b

    wq, bq = lin(keys[0], keys[1])
    wk, bk = lin(keys[2], keys[3])
    wv, bv = lin(keys[4], keys[5])
    wo, bo = lin(keys[6], keys[7])
    return (wq, bq, wk, bk, wv, bv, wo, bo)


def _matched_reference(x, mask, params, hyperbolic_scale, temperature,
                       compute_dtype=jnp.bfloat16):
    """Pure-JAX reference mirroring the kernel's bf16-operand / f32-accum math."""
    B, S, D = x.shape
    wq, bq, wk, bk, wv, bv, wo, bo = params
    scale = hyperbolic_scale / (math.sqrt(D) * temperature)
    cd = compute_dtype
    xb = x.astype(cd)
    q = jnp.einsum("bsd,de->bse", xb, (wq * scale).astype(cd),
                   preferred_element_type=jnp.float32) + bq * scale
    k = jnp.einsum("bsd,de->bse", xb, wk.astype(cd),
                   preferred_element_type=jnp.float32) + bk
    v = jnp.einsum("bsd,de->bse", xb, wv.astype(cd),
                   preferred_element_type=jnp.float32) + bv
    q, k, v = q.astype(cd), k.astype(cd), v.astype(cd)
    scores = jnp.einsum("bqd,bkd->bqk", q, k, preferred_element_type=jnp.float32)
    if mask is not None:
        scores = scores + mask
    m = jnp.max(scores, axis=-1, keepdims=True)
    p = jnp.exp(scores - m)
    attn = p / jnp.sum(p, axis=-1, keepdims=True)
    ctx = jnp.einsum("bqk,bkd->bqd", attn.astype(cd), v,
                     preferred_element_type=jnp.float32)
    out = jnp.einsum("bsd,de->bse", ctx.astype(cd), wo.astype(cd),
                     preferred_element_type=jnp.float32) + bo
    return out, attn


def _f32_reference(x, mask, params, hyperbolic_scale, temperature):
    """Full-precision reference of the module semantics."""
    B, S, D = x.shape
    wq, bq, wk, bk, wv, bv, wo, bo = params
    scale = hyperbolic_scale / (math.sqrt(D) * temperature)
    q = x @ wq + bq
    k = x @ wk + bk
    v = x @ wv + bv
    scores = jnp.einsum("bqd,bkd->bqk", q, k) * scale
    if mask is not None:
        scores = scores + mask
    attn = jax.nn.softmax(scores, axis=-1)
    out = jnp.einsum("bqk,bkd->bqd", attn, v) @ wo + bo
    return out, attn


if __name__ == "__main__":
    # Small config: batch=2, seq=8, latent_dim=32.
    B, S, D = 2, 8, 32
    hyperbolic_scale = 1.0
    temperature = 1.0

    key = jax.random.PRNGKey(0)
    kx, kp = jax.random.split(key)
    x = jax.random.normal(kx, (B, S, D), dtype=jnp.float32)
    params = init_params(kp, D)
    packed = prepare_params(params, hyperbolic_scale=hyperbolic_scale,
                            temperature=temperature)

    # --- unmasked path (mask=None specialization: no mask DMA at all) ---
    out, aux = standardized_attention(x, None, packed)
    out = jax.block_until_ready(out)
    attn = jax.block_until_ready(aux["attention_weights"])

    ref_out, ref_attn = _matched_reference(x, None, params,
                                           hyperbolic_scale, temperature)
    f32_out, f32_attn = _f32_reference(x, None, params,
                                       hyperbolic_scale, temperature)

    assert out.shape == (B, S, D) and attn.shape == (B, S, S)
    # Check vs. a reference using the same bf16-operand / f32-accum math.
    assert jnp.allclose(out, ref_out, atol=5e-3, rtol=5e-3), \
        float(jnp.max(jnp.abs(out - ref_out)))
    assert jnp.allclose(attn, ref_attn, atol=5e-3, rtol=5e-3), \
        float(jnp.max(jnp.abs(attn - ref_attn)))
    assert jnp.allclose(jnp.sum(attn, axis=-1), 1.0, atol=2e-3)
    # Looser check vs. the full-f32 module semantics (bf16 operand rounding).
    assert jnp.allclose(out, f32_out, atol=5e-2, rtol=5e-2), \
        float(jnp.max(jnp.abs(out - f32_out)))
    assert jnp.allclose(attn, f32_attn, atol=5e-2, rtol=5e-2), \
        float(jnp.max(jnp.abs(attn - f32_attn)))

    # --- masked (causal) path: exercises the mask-carrying kernel variant ---
    keep = jnp.tril(jnp.ones((S, S), dtype=jnp.bool_))
    mask = jnp.broadcast_to(jnp.where(keep, 0.0, -1e9).astype(jnp.float32),
                            (B, S, S))
    out_m, aux_m = standardized_attention(x, mask, packed)
    out_m = jax.block_until_ready(out_m)
    attn_m = jax.block_until_ready(aux_m["attention_weights"])

    ref_out_m, ref_attn_m = _matched_reference(x, mask, params,
                                               hyperbolic_scale, temperature)
    assert jnp.allclose(out_m, ref_out_m, atol=5e-3, rtol=5e-3), \
        float(jnp.max(jnp.abs(out_m - ref_out_m)))
    assert jnp.allclose(attn_m, ref_attn_m, atol=5e-3, rtol=5e-3), \
        float(jnp.max(jnp.abs(attn_m - ref_attn_m)))
    future = jnp.triu(jnp.ones((S, S), dtype=jnp.bool_), k=1)[None]
    assert jnp.all(jnp.where(future, attn_m, 0.0) < 1e-6)

    print("KERNEL_OK")
</pallas_src>

<mosaic_0001>
module attributes {stable_mosaic.version = 11 : i64} {
  func.func @_conformal_attention_kernel(%arg0: i32, %arg1: memref<1x8x32xf32, #tpu.memory_space<vmem>>, %arg2: memref<32x384xbf16, #tpu.memory_space<vmem>>, %arg3: memref<1x384xf32, #tpu.memory_space<vmem>>, %arg4: memref<128x128xbf16, #tpu.memory_space<vmem>>, %arg5: memref<1x128xf32, #tpu.memory_space<vmem>>, %arg6: memref<1x8x128xf32, #tpu.memory_space<vmem>>, %arg7: memref<1x8x8xf32, #tpu.memory_space<vmem>>) attributes {dimension_semantics = [#tpu.dimension_semantics<parallel>], iteration_bounds = array<i64: 2>, scalar_prefetch = 0 : i64, scratch_operands = 0 : i64, tpu.core_type = #tpu.core_type<tc>, window_params = [{transform_indices = @transform_0, window_bounds = array<i64: 1, 8, 32>}, {pipeline_mode = #tpu.pipeline_mode<synchronous>, transform_indices = @transform_1, window_bounds = array<i64: 32, 384>}, {pipeline_mode = #tpu.pipeline_mode<synchronous>, transform_indices = @transform_2, window_bounds = array<i64: 1, 384>}, {pipeline_mode = #tpu.pipeline_mode<synchronous>, transform_indices = @transform_3, window_bounds = array<i64: 128, 128>}, {pipeline_mode = #tpu.pipeline_mode<synchronous>, transform_indices = @transform_4, window_bounds = array<i64: 1, 128>}, {transform_indices = @transform_5, window_bounds = array<i64: 1, 8, 128>}, {transform_indices = @transform_6, window_bounds = array<i64: 1, 8, 8>}]} {
    %c0 = arith.constant 0 : index
    %c0_0 = arith.constant 0 : index
    %c0_1 = arith.constant 0 : index
    %0 = vector.load %arg1[%c0, %c0_0, %c0_1] : memref<1x8x32xf32, #tpu.memory_space<vmem>>, vector<1x8x32xf32>
    %1 = vector.shape_cast %0 : vector<1x8x32xf32> to vector<8x32xf32>
    %2 = arith.truncf %1 : vector<8x32xf32> to vector<8x32xbf16>
    %c0_2 = arith.constant 0 : index
    %c0_3 = arith.constant 0 : index
    %3 = vector.load %arg2[%c0_2, %c0_3] : memref<32x384xbf16, #tpu.memory_space<vmem>>, vector<32x384xbf16>
    %cst = arith.constant dense<0.000000e+00> : vector<8x384xf32>
    %4 = tpu.matmul %2, %3, %cst {dimension_numbers = #tpu.dot_dimension_numbers<[1], [0], [0], [1], [0, 0, 1, 1], [], []>} : vector<8x32xbf16>, vector<32x384xbf16>, vector<8x384xf32> -> vector<8x384xf32>
    %c0_4 = arith.constant 0 : index
    %c0_5 = arith.constant 0 : index
    %5 = vector.load %arg3[%c0_4, %c0_5] : memref<1x384xf32, #tpu.memory_space<vmem>>, vector<1x384xf32>
    %6 = vector.broadcast %5 : vector<1x384xf32> to vector<8x384xf32>
    %7 = arith.addf %4, %6 : vector<8x384xf32>
    %8 = vector.extract_strided_slice %7 {offsets = [0, 0], sizes = [8, 128], strides = [1, 1]} : vector<8x384xf32> to vector<8x128xf32>
    %9 = arith.truncf %8 : vector<8x128xf32> to vector<8x128xbf16>
    %10 = vector.extract_strided_slice %7 {offsets = [0, 128], sizes = [8, 128], strides = [1, 1]} : vector<8x384xf32> to vector<8x128xf32>
    %11 = arith.truncf %10 : vector<8x128xf32> to vector<8x128xbf16>
    %12 = vector.extract_strided_slice %7 {offsets = [0, 256], sizes = [8, 128], strides = [1, 1]} : vector<8x384xf32> to vector<8x128xf32>
    %13 = arith.truncf %12 : vector<8x128xf32> to vector<8x128xbf16>
    %cst_6 = arith.constant dense<0.000000e+00> : vector<8x8xf32>
    %14 = tpu.matmul %9, %11, %cst_6 {dimension_numbers = #tpu.dot_dimension_numbers<[1], [1], [0], [0], [0, 0, 1, 0], [], []>} : vector<8x128xbf16>, vector<8x128xbf16>, vector<8x8xf32> -> vector<8x8xf32>
    %cst_7 = arith.constant dense<0xFF800000> : vector<8xf32>
    %15 = vector.multi_reduction <maximumf>, %14, %cst_7 [1] : vector<8x8xf32> to vector<8xf32>
    %16 = vector.shape_cast %15 : vector<8xf32> to vector<8x1xf32>
    %17 = vector.broadcast %16 : vector<8x1xf32> to vector<8x8xf32>
    %18 = arith.subf %14, %17 : vector<8x8xf32>
    %19 = math.exp %18 : vector<8x8xf32>
    %cst_8 = arith.constant dense<0.000000e+00> : vector<8xf32>
    %20 = vector.multi_reduction <add>, %19, %cst_8 [1] : vector<8x8xf32> to vector<8xf32>
    %21 = vector.shape_cast %20 : vector<8xf32> to vector<8x1xf32>
    %22 = vector.broadcast %21 : vector<8x1xf32> to vector<8x8xf32>
    %23 = arith.divf %19, %22 : vector<8x8xf32>
    %24 = arith.truncf %23 : vector<8x8xf32> to vector<8x8xbf16>
    %cst_9 = arith.constant dense<0.000000e+00> : vector<8x128xf32>
    %25 = tpu.matmul %24, %13, %cst_9 {dimension_numbers = #tpu.dot_dimension_numbers<[1], [0], [0], [1], [0, 0, 1, 1], [], []>} : vector<8x8xbf16>, vector<8x128xbf16>, vector<8x128xf32> -> vector<8x128xf32>
    %26 = arith.truncf %25 : vector<8x128xf32> to vector<8x128xbf16>
    %c0_10 = arith.constant 0 : index
    %c0_11 = arith.constant 0 : index
    %27 = vector.load %arg4[%c0_10, %c0_11] : memref<128x128xbf16, #tpu.memory_space<vmem>>, vector<128x128xbf16>
    %cst_12 = arith.constant dense<0.000000e+00> : vector<8x128xf32>
    %28 = tpu.matmul %26, %27, %cst_12 {dimension_numbers = #tpu.dot_dimension_numbers<[1], [0], [0], [1], [0, 0, 1, 1], [], []>} : vector<8x128xbf16>, vector<128x128xbf16>, vector<8x128xf32> -> vector<8x128xf32>
    %c0_13 = arith.constant 0 : index
    %c0_14 = arith.constant 0 : index
    %29 = vector.load %arg5[%c0_13, %c0_14] : memref<1x128xf32, #tpu.memory_space<vmem>>, vector<1x128xf32>
    %30 = vector.broadcast %29 : vector<1x128xf32> to vector<8x128xf32>
    %31 = arith.addf %28, %30 : vector<8x128xf32>
    %c0_15 = arith.constant 0 : index
    %c0_16 = arith.constant 0 : index
    %c0_17 = arith.constant 0 : index
    %32 = vector.load %arg6[%c0_15, %c0_16, %c0_17] : memref<1x8x128xf32, #tpu.memory_space<vmem>>, vector<1x8x128xf32>
    %33 = vector.shape_cast %32 : vector<1x8x128xf32> to vector<8x128xf32>
    %34 = vector.shape_cast %31 : vector<8x128xf32> to vector<1x8x128xf32>
    tpu.vector_store %arg6[%c0_15, %c0_16, %c0_17], %34 {strides = array<i32>} : memref<1x8x128xf32, #tpu.memory_space<vmem>>, vector<1x8x128xf32>,
    %c0_18 = arith.constant 0 : index
    %c0_19 = arith.constant 0 : index
    %c0_20 = arith.constant 0 : index
    %35 = vector.load %arg7[%c0_18, %c0_19, %c0_20] : memref<1x8x8xf32, #tpu.memory_space<vmem>>, vector<1x8x8xf32>
    %36 = vector.shape_cast %35 : vector<1x8x8xf32> to vector<8x8xf32>
    %37 = vector.shape_cast %23 : vector<8x8xf32> to vector<1x8x8xf32>
    tpu.vector_store %arg7[%c0_18, %c0_19, %c0_20], %37 {strides = array<i32>} : memref<1x8x8xf32, #tpu.memory_space<vmem>>, vector<1x8x8xf32>,
    return
  }
  func.func @transform_0(%arg0: i32) -> (i32, i32, i32) {
    %c0_i32 = arith.constant 0 : i32
    %c0_i32_0 = arith.constant 0 : i32
    %c0_i32_1 = arith.constant 0 : i32
    return %arg0, %c0_i32, %c0_i32_0 : i32, i32, i32
  }
  func.func @transform_1(%arg0: i32) -> (i32, i32) {
    %c0_i32 = arith.constant 0 : i32
    %c0_i32_0 = arith.constant 0 : i32
    %c0_i32_1 = arith.constant 0 : i32
    return %c0_i32, %c0_i32_0 : i32, i32
  }
  func.func @transform_2(%arg0: i32) -> (i32, i32) {
    %c0_i32 = arith.constant 0 : i32
    %c0_i32_0 = arith.constant 0 : i32
    %c0_i32_1 = arith.constant 0 : i32
    return %c0_i32, %c0_i32_0 : i32, i32
  }
  func.func @transform_3(%arg0: i32) -> (i32, i32) {
    %c0_i32 = arith.constant 0 : i32
    %c0_i32_0 = arith.constant 0 : i32
    %c0_i32_1 = arith.constant 0 : i32
    return %c0_i32, %c0_i32_0 : i32, i32
  }
  func.func @transform_4(%arg0: i32) -> (i32, i32) {
    %c0_i32 = arith.constant 0 : i32
    %c0_i32_0 = arith.constant 0 : i32
    %c0_i32_1 = arith.constant 0 : i32
    return %c0_i32, %c0_i32_0 : i32, i32
  }
  func.func @transform_5(%arg0: i32) -> (i32, i32, i32) {
    %c0_i32 = arith.constant 0 : i32
    %c0_i32_0 = arith.constant 0 : i32
    %c0_i32_1 = arith.constant 0 : i32
    return %arg0, %c0_i32, %c0_i32_0 : i32, i32, i32
  }
  func.func @transform_6(%arg0: i32) -> (i32, i32, i32) {
    %c0_i32 = arith.constant 0 : i32
    %c0_i32_0 = arith.constant 0 : i32
    %c0_i32_1 = arith.constant 0 : i32
    return %arg0, %c0_i32, %c0_i32_0 : i32, i32, i32
  }
}

</mosaic_0001>

<bundles_post_ra>
// kernel: tpu_custom_call.1
= control target key start
LH: loop header
LB: loop body
LE: loop exit
PB: predicated region body
PF: predicated region fallthrough
CT: control target
= control target key end

     0   :  { %12 = vsyncpa [#allocation3], 0  ;;  %s1376_s0 = inlined_call_operand.hbm [shape: f32[2,8,32], index: 0, kind: input, shape index: {}]   ;;  %s1377_s1 = inlined_call_operand.hbm [shape: bf16[32,384], index: 1, kind: input, shape index: {}]   ;;  %s1378_s2 = inlined_call_operand.hbm [shape: f32[1,384], index: 2, kind: input, shape index: {}]   ;;  %s1379_s3 = inlined_call_operand.hbm [shape: bf16[128,128], index: 3, kind: input, shape index: {}]   ;;  %s1380_s4 = inlined_call_operand.vmem [shape: f32[1,128], index: 4, kind: input, shape index: {}]   ;;  %s1381_s5 = inlined_call_operand.hbm [shape: f32[2,8,128], index: 5, kind: output, shape index: {0}]   ;;  %s1382_s6 = inlined_call_operand.hbm [shape: f32[2,8,8], index: 6, kind: output, shape index: {1}]  }
   0x1   :  { %14 = vsyncpa [#allocation3 + $0x1], 0 }
   0x2   :  { %15 = vsyncpa [#allocation6], 0 }
   0x3   :  { %16 = vsyncpa [#allocation9], 0 }
   0x4   :  { %17 = vsyncpa [#allocation4], 0 }
   0x5   :  { %19 = vsyncpa [#allocation4 + $0x1], 0 }
   0x6   :  { %20 = vsyncpa [#allocation12], 0 }
   0x7   :  { %22 = vsyncpa [#allocation12 + $0x1], 0  ;;  %s1191_s21 = smov 0   ;;  %s1193_s22 = smov 0  }
   0x8   :  { %s1195_s23 = smov 0   ;;  %s1197_s24 = smov 0  }
   0x9 LB: > { %s206_s27 = sshll.u32 %s1377_s1, 4  ;;  %s1215_s28 = sadd.s32 4294967295, %s1147_s24   ;;  %s1147_s24 = sphi %s1197_s24, %s1393_s24   ;;  %s1143_s23 = sphi %s1195_s23, %s1392_s23   ;;  %s1139_s22 = sphi %s1193_s22, %s1391_s22   ;;  %s1135_s21 = sphi %s1191_s21, %s1390_s21   ;;  %s207_s27 = int_to_ptr.hbm [resolvable:$true] %s206_s27 }
   0xa   : > { %p736_p0 = scmp.ge.s32.totalorder %s1147_s24, 1  ;;  %p49_p1 = scmp.eq.s32.totalorder %s1215_s28, 0 }
   0xb   : > { %p195_p2 = scmp.lt.s32.totalorder %s1147_s24, 3  ;;  %s1149_s30 = smov [#allocation5]  }
   0xc   : > { %s208_s7 = sshll.u32 %s1149_s30, 4  ;;  %s221_s10 = sshll.u32 %s1378_s2, 4  ;;  %s209_s7 = int_to_ptr.vmem [resolvable:$true] %s208_s7  ;;  %s222_s10 = int_to_ptr.hbm [resolvable:$true] %s221_s10 }
   0xd   : > { %p1220_p3 = pnand %p736_p0, %p195_p2  ;;  %s232_s14 = sshll.u32 %s1379_s3, 4  ;;  %s233_s14 = int_to_ptr.hbm [resolvable:$true] %s232_s14 }
   0xe   : > { %s1150_s15 = smov [#allocation7]   ;;  %s1151_s17 = smov 192  }
   0xf   : > { %p848_p4 = pneg %p1220_p3  ;;  %s223_s16 = sshll.u32 %s1150_s15, 4  ;;  %s224_s16 = int_to_ptr.vmem [resolvable:$true] %s223_s16 }
  0x10   : > { %s1152_s18 = smov 12   ;;  %s1153_s19 = smov [#allocation8]  }
  0x11   : > { %p1232_p6 = pnand %p848_p4, %p49_p1  ;;  %s234_s20 = sshll.u32 %s1153_s19, 4  ;;  %s235_s20 = int_to_ptr.vmem [resolvable:$true] %s234_s20 }
  0x12   : > { %s1154_s25 = smov 64   ;;  %s1155_s26 = smov 4  }
  0x13   : > { %851 = dma.hbm_to_vmem [thread:$0]  (!%p1232_p6), %s207_s27, 768, %s209_s7, [#allocation6], %s1151_s17, %s1151_s17, %s1152_s18  }
  0x14   : > { %854 = dma.hbm_to_vmem [thread:$0]  (!%p1232_p6), %s222_s10, 48, %s224_s16, [#allocation6]  }
  0x15   : > { %857 = dma.hbm_to_vmem [thread:$0]  (!%p1232_p6), %s233_s14, 1024, %s235_s20, [#allocation9], %s1154_s25, %s1154_s25, %s1155_s26  }
  0x16   : > { %s735_s30 = sadd.s32 4294967294, %s1147_s24   ;;  %s1247_s27 = sadd.s32 1, %s1147_s24  }
  0x17   : > { %s35_s7 = sadd.s32 1, %s1143_s23  ;;  %s32_s8 = ssub.s32 %s1147_s24, %s1247_s27 }
  0x18   : > { %p42_p7 = scmp.ne.s32.totalorder %s1143_s23, %s1139_s22  ;;  %p33_p8 = scmp.eq.s32.totalorder %s32_s8, 0 }
  0x19   : > { %p43_p9 = scmp.eq.s32.totalorder %s1147_s24, 0  ;;  %p48_p10 = scmp.ne.s32.totalorder %s1139_s22, %s1135_s21 }
  0x1a   : > { %p156_p11 = scmp.eq.s32.totalorder %s1215_s28, 1  ;;  %p162_p0 = scmp.eq.s32.totalorder %s735_s30, 1 }
  0x1b   : > { %s1259_s9 = scalar_select %p33_p8, %s1143_s23, %s35_s7  }
  0x1c   : > { %p1263_p12 = por %p49_p1, %p48_p10  ;;  %p1267_p13 = por %p156_p11, %p42_p7 }
  0x1d   : > { %p44_p2 = por %p43_p9, %p42_p7  ;;  %s251_s12 = sand.u32 1, %s1143_s23  }
  0x1e   : > { %p1272_p4 = por %p162_p0, %p48_p10  ;;  %p872_p6 = scmp.lt.s32.totalorder %s1147_s24, 2 }
  0x1f   : > { %s741_s14 = sshll.u32 %s251_s12, 3  ;;  %s742_s15 = sshll.u32 %s1147_s24, 3 }
  0x20   : > { %s259_s18 = scalar_lea.hbm %s1376_s0, %s742_s15  ;;  %s255_s20 = scalar_lea.vmem [#allocation2], %s741_s14 }
  0x21   : > { %s261_s19 = sshll.u32 %s259_s18, 4  ;;  %s263_s25 = sshll.u32 %s255_s20, 4  ;;  %s262_s19 = int_to_ptr.hbm [resolvable:$true] %s261_s19  ;;  %s264_s25 = int_to_ptr.vmem [resolvable:$true] %s263_s25 }
  0x22   : > { %p1281_p8 = pnand %p872_p6, %p44_p2  ;;  %s252_s30 = scalar_lea.sflag [#allocation3], %s251_s12 }
  0x23   : > { %s1011_s7 = sshra.s32 %s262_s19, 4  ;;  %s1018_s14 = scalar_lea.hbm %s1376_s0, 16  ;;  %s1012_s7 = int_to_ptr.hbm [resolvable:$true] %s1011_s7 }
  0x24   : > { %s1013_s8 = scalar_lea.hbm %s1012_s7, 8  ;;  %p1015_p9 = pneg %p1281_p8 }
  0x25   : > { %p1014_p7 = scmp.ne.s32.totalorder %s1012_s7, %s1013_s8  ;;  %p1019_p0 = scmp.lt.s32.totalorder %s1012_s7, %s1376_s0 }
  0x26   : > { %p1020_p2 = scmp.lt.s32.totalorder %s1018_s14, %s1013_s8 }
  0x27   : > { %p1016_p10 = pnand %p1015_p9, %p1014_p7 }
  0x28   : > { %p1021_p6 = por %p1020_p2, %p1019_p0 }
  0x29   : > { %p1017_p11 = pneg %p1016_p10 }
  0x2b   : > { %p1022_p5 = pnand %p1021_p6, %p1017_p11 }
  0x2d   : > { %1025 = shalt.err (!%p1022_p5)
}
  0x2e   : > { %861 = dma.hbm_to_vmem [thread:$0]  (!%p1281_p8), %s262_s19, 128, %s264_s25, %s252_s30  }
  0x2f   : > { %272 = sbr.rel (%p1220_p3) target bundleno = 870 (0x366), region = 40  ;;  %s1298_s12 = sand.u32 (!%p1220_p3), 1, %s1139_s22  }
  0x30   : > { %s1301_s20 = sshll.u32 (!%p1220_p3), %s1298_s12, 3  ;;  %s275_s7 = scalar_lea.sflag (!%p1220_p3), [#allocation3], %s1298_s12 }
  0x31   : > { %s278_s8 = scalar_lea.vmem (!%p1220_p3), [#allocation2], %s1301_s20 }
  0x34   : > { %1114 = dma.done.wait (%p1263_p12), %s275_s7, 128  }
  0x35   : > { %1116 = vsyncadd (%p1263_p12), %s275_s7, 4294967168 }
  0x36   : > { %1118 = dma.done.wait (%p49_p1), [#allocation6], 816  }
  0x37   : > { %1120 = vsyncadd (%p49_p1), [#allocation6], 4294966480 }
  0x38   : > { %1122 = dma.done.wait (%p49_p1), [#allocation9], 1024  }
  0x39   : > { %1124 = vsyncadd (%p49_p1), [#allocation9], 4294966272  ;;  %v819_v0 = vld [vmem:[#allocation5 + $0x1c] sm:$0xf]  ;;  %v766_v1 = vld [vmem:[#allocation5 + $0x24] sm:$0xf0] }
  0x3a   : > { %v816_v2 = vld [vmem:[#allocation5 + $0x4] sm:$0xf]  ;;  %v769_v3 = vor.u32 %v819_v0, %v766_v1  ;;  %v754_v4 = vld [vmem:[#allocation5 + $0xc] sm:$0xf0]  ;;  %v764_v5 = vld [vmem:[#allocation5 + $0x18] sm:$0xf] }
  0x3b   : > { %v820_v6 = vld [vmem:[#allocation5 + $0x20] sm:$0xf0]  ;;  %v752_v8 = vld [vmem:[#allocation5] sm:$0xf]  ;;  %v817_v9 = vld [vmem:[#allocation5 + $0x8] sm:$0xf0]  ;;  %v757_v10 = vor.u32 %v816_v2, %v754_v4 }
  0x3c   : > { %v765_v7 = vor.u32 %v820_v6, %v764_v5  ;;  %402 = vmatpush.bf16.msra.mxu2 %v769_v3  ;;  %v329_v11 = vld [vmem:[%s278_s8] sm:$0xff]  ;;  %v753_v12 = vor.u32 %v817_v9, %v752_v8  ;;  %vm379_vm0 = vcmask 261120   ;;  %v772_v25 = vld [vmem:[#allocation5 + $0x20] sm:$0xf]  ;;  %v821_v26 = vld [vmem:[#allocation5 + $0x28] sm:$0xf0] }
  0x3d   : > { %v330_v13 = vpack.c.bf16 %v329_v11, %v329_v11  ;;  %v339_v14 = vld [vmem:[#allocation7] sm:$0x7]  ;;  %v760_v27 = vld [vmem:[#allocation5 + $0x8] sm:$0xf]  ;;  %v773_v28 = vor.u32 %v821_v26, %v772_v25  ;;  %v818_v29 = vld [vmem:[#allocation5 + $0x10] sm:$0xf0] }
  0x3e   : > { %389 = vmatpush.bf16.msra.mxu0 %v765_v7  ;;  %v342_v16 = vperm.slane %v339_v14, 1  ;;  %v341_v17 = vperm.slane %v339_v14, 0  ;;  %v761_v30 = vor.u32 %v818_v29, %v760_v27  ;;  %vm438_vm1 = vcmask 64512   ;;  %v829_v45 = vld [vmem:[#allocation8 + $0x38] sm:$0xff]  ;;  %v828_v46 = vld [vmem:[#allocation8 + $0x30] sm:$0xff]  ;;  %v827_v47 = vld [vmem:[#allocation8 + $0x28] sm:$0xff] }
  0x3f   : > { %v343_v41 = vperm.slane %v339_v14, 2  ;;  %vm467_vm2 = vcmask 1043456   ;;  %553 = vmatpush.bf16.msra.mxu1 %v829_v45  ;;  %v826_v49 = vld [vmem:[#allocation8 + $0x20] sm:$0xff]  ;;  %v825_v50 = vld [vmem:[#allocation8 + $0x18] sm:$0xff]  ;;  %v824_v53 = vld [vmem:[#allocation8 + $0x10] sm:$0xff]  ;;  %s327_s29 = scalar_lea.vmem [#allocation11], %s1301_s20 }
  0x40   : > { %403 = vmatpush.bf16.msra.mxu2 %v757_v10  ;;  %v823_v58 = vld [vmem:[#allocation8 + $0x8] sm:$0xff]  ;;  %v822_v1 = vld [vmem:[#allocation8] sm:$0xff]  ;;  %s812_s10 = sshll.u32 %s1215_s28, 3  ;;  %s600_s30 = sshll.u32 %s327_s29, 4  ;;  %s601_s30 = int_to_ptr.vmem [resolvable:$true] %s600_s30 }
  0x41   : > { %s598_s26 = scalar_lea.hbm %s1382_s6, %s812_s10  ;;  %s574_s16 = scalar_lea.sflag [#allocation12], %s1298_s12 }
  0x42   : > { %390 = vmatpush.bf16.msra.mxu0 %v753_v12  ;;  %s602_s15 = sshll.u32 %s598_s26, 4  ;;  %s1061_s28 = scalar_lea.hbm %s1382_s6, 16  ;;  %s603_s15 = int_to_ptr.hbm [resolvable:$true] %s602_s15 }
  0x43   : > { %775 = vmatmul.msk.bf16.vlgmr.msra.gmra.mxu2 %vm379_vm0, %v330_v13  ;;  %554 = vmatpush.bf16.msra.mxu1 %v828_v46  ;;  %s1055_s14 = sshra.s32 %s603_s15, 4  ;;  %s1056_s14 = int_to_ptr.hbm [resolvable:$true] %s1055_s14 }
  0x44   : > { %415 = vmatpush.bf16.msrb.mxu2 %v773_v28  ;;  %s1057_s17 = scalar_lea.hbm %s1056_s14, 8  ;;  %p1062_p12 = scmp.lt.s32.totalorder %s1056_s14, %s1382_s6 }
  0x45   : > { %774 = vmatmul.msk.bf16.vlgmr.msra.gmra.mxu0 %vm379_vm0, %v330_v13  ;;  %p1058_p1 = scmp.ne.s32.totalorder %s1056_s14, %s1057_s17  ;;  %p1063_p8 = scmp.lt.s32.totalorder %s1061_s28, %s1057_s17 }
  0x47   : > { %555 = vmatpush.bf16.msra.mxu1 %v827_v47  ;;  %p1059_p3 = pnand %p1058_p1, %p1267_p13  ;;  %p1064_p7 = por %p1063_p8, %p1062_p12 }
  0x48   : > { %416 = vmatpush.bf16.msrb.mxu2 %v761_v30 }
  0x49   : > { %p1060_p5 = pneg %p1059_p3 }
  0x4b   : > { %556 = vmatpush.bf16.msra.mxu1 %v826_v49  ;;  %p1065_p9 = pnand %p1064_p7, %p1060_p5 }
  0x4f   : > { %557 = vmatpush.bf16.msra.mxu1 %v825_v50 }
  0x53   : > { %776 = vmatmul.msk.bf16.vlgmr.msrb.gmra.mxu2 %vm379_vm0, %v330_v13  ;;  %558 = vmatpush.bf16.msra.mxu1 %v824_v53 }
  0x57   : > { %559 = vmatpush.bf16.msra.mxu1 %v823_v58 }
  0x5b   : > { %560 = vmatpush.bf16.msra.mxu1 %v822_v1 }
  0xc2   : > { %v392_v15 = vpop.f32.mrf.mxu0 }
  0xc3   : > { %v393_v22 = vadd.f32 %v392_v15, %v341_v17 }
  0xc5   : > { %v422_v23 = vpack.c.bf16 %v393_v22, %v393_v22 }
  0xc6   : > { %v405_v18 = vpop.f32.mrf.mxu2 }
  0xc7   : > { %v406_v19 = vadd.f32 %v405_v18, %v342_v16 }
  0xc9   : > { %v423_v20 = vpack.c.bf16 %v406_v19, %v406_v19 }
  0xca   : > { %v394_v21 = vpop.f32.mrf.mxu0 }
  0xcb   : > { %432 = vmatpush.bf16.xpose.msra.mxu3 %v423_v20 }
  0xce   : > { %v407_v24 = vpop.f32.mrf.mxu2 }
  0xd2   : > { %433 = vmatmul.bf16.vlgmr.msra.gmra.mxu3 %v422_v23 }
  0xd6   : > { %v418_v35 = vpop.f32.mrf.mxu2 }
  0xd7   : > { %v419_v42 = vadd.f32 %v418_v35, %v343_v41 }
  0xd9   : > { %v424_v43 = vpack.c.bf16 %v419_v42, %v419_v42 }
  0xdb   : > { %v469_v44 = vsel %vm467_vm2, %v424_v43, 0 }
  0xdc   : > { %478 = vmatpush.bf16.msrb.mxu0 %v469_v44 }
  0xde   : > { %v420_v38 = vpop.f32.mrf.mxu2 }
 0x155   : > { %v434_v31 = vpop.f32.mrf.mxu3 }
 0x156   : > { %v439_v32 = vsel %vm438_vm1, %v434_v31, -inf }
 0x157   : > { %440 = vmax.xlane.f32.xlu0 %v439_v32 }
 0x15d   : > { %v436_v33 = vpop.f32.mrf.mxu3 }
 0x1ca   : > { %v441_v34 = vpop.xlane.xlu0 %440 }
 0x1cb   : > { %v442_v36 = vsub.f32 %v434_v31, %v441_v34 }
 0x1cd   : > { %v443_v37 = vmul.f32 1.442695, %v442_v36 }
 0x1cf   : > { %917 = vpow2.f32 %v443_v37 }
 0x1d5   : > { %v918_v39 = vpop.eup %917 }
 0x1d6   : > { %v445_v40 = vsel %vm438_vm1, %v918_v39, 0.0 }
 0x1d7   : > { %446 = vadd.xlane.f32.xlu0 %v445_v40 }
 0x24a   : > { %v447_v48 = vpop.xlane.xlu0 %446 }
 0x24b   : > { %919 = vrcp.f32 %v447_v48  ;;  %v459_v55 = vand.u32 2147483648, %v447_v48  ;;  %v457_v57 = vand.u32 2147483647, %v447_v48  ;;  %vm453_vm4 = vweird.f32 %v447_v48 }
 0x24d   : > { %v460_v60 = vor.u32 1.1754944e-38, %v459_v55  ;;  %vm458_vm6 = vcmp.eq.f32.partialorder %v457_v57, 8.507059e+37 }
 0x251   : > { %v920_v51 = vpop.eup %919 }
 0x252   : > { %v449_v52 = vmul.f32 %v920_v51, %v447_v48  ;;  %vm454_vm3 = vweird.f32 %v920_v51 }
 0x253   : > { %vm455_vm5 = vmor %vm453_vm4, %vm454_vm3 }
 0x254   : > { %v450_v54 = vsub.f32 1.0, %v449_v52 }
 0x256   : > { %v451_v56 = vmul.f32 %v920_v51, %v450_v54 }
 0x258   : > { %v452_v59 = vadd.f32 %v920_v51, %v451_v56 }
 0x25a   : > { %v456_v61 = vsel %vm455_vm5, %v920_v51, %v452_v59 }
 0x25b   : > { %v461_v62 = vsel %vm458_vm6, %v460_v60, %v456_v61 }
 0x25c   : > { %v462_v63 = vmul.f32 %v918_v39, %v461_v62 }
 0x25e   : > { %v463_v0 = vpack.c.bf16 %v462_v63, %v462_v63  ;;  %567 = vst.msk [vmem:[%s327_s29] sm:$0xff] %vm438_vm1, %v462_v63 }
 0x260   : > { %777 = vmatmul.msk.bf16.vlgmr.msrb.gmra.mxu0 %vm438_vm1, %v463_v0 }
 0x2dd   : > { %v480_v2 = vpop.f32.mrf.mxu0 }
 0x2de   : > { %v484_v3 = vpack.c.bf16 %v480_v2, %v480_v2 }
 0x2e0   : > { %561 = vmatmul.bf16.vlgmr.msra.gmra.mxu1 %v484_v3 }
 0x2e5   : > { %v482_v4 = vpop.f32.mrf.mxu0 }
 0x2e6   : > { %1068 = shalt.err (!%p1065_p9)
}
 0x2e7   : > { %845 = dma.vmem_to_hbm [thread:$0]  (%p1267_p13), %s601_s30, 128, %s603_s15, %s574_s16   ;;  %v916_v5 = vld [vmem:[%s1380_s4] ss:$0 sm:$0xff] }
 0x2e8   : > { %s584_s26 = scalar_lea.hbm %s1381_s5, %s812_s10  ;;  %s320_s8 = scalar_lea.vmem [#allocation10], %s1301_s20 }
 0x2e9   : > { %s586_s14 = sshll.u32 %s320_s8, 4  ;;  %s588_s17 = sshll.u32 %s584_s26, 4  ;;  %s587_s14 = int_to_ptr.vmem [resolvable:$true] %s586_s14  ;;  %s589_s17 = int_to_ptr.hbm [resolvable:$true] %s588_s17 }
 0x2ea   : > { %s569_s28 = scalar_lea.sflag [#allocation4], %s1298_s12  ;;  %s1083_s19 = sshra.s32 %s589_s17, 4  ;;  %s1084_s19 = int_to_ptr.hbm [resolvable:$true] %s1083_s19 }
 0x2eb   : > { %s1085_s30 = scalar_lea.hbm %s1084_s19, 8  ;;  %s1089_s16 = scalar_lea.hbm %s1381_s5, 16 }
 0x2ec   : > { %p1086_p10 = scmp.ne.s32.totalorder %s1084_s19, %s1085_s30  ;;  %p1090_p2 = scmp.lt.s32.totalorder %s1084_s19, %s1381_s5 }
 0x2ed   : > { %p1091_p6 = scmp.lt.s32.totalorder %s1089_s16, %s1085_s30 }
 0x2ee   : > { %p1087_p11 = pnand %p1086_p10, %p1267_p13 }
 0x2ef   : > { %p1092_p1 = por %p1091_p6, %p1090_p2 }
 0x2f0   : > { %p1088_p0 = pneg %p1087_p11 }
 0x2f2   : > { %p1093_p3 = pnand %p1092_p1, %p1088_p0 }
 0x35d   : > { %v562_v6 = vpop.f32.mrf.mxu1 }
 0x35e   : > { %v563_v7 = vadd.f32 %v916_v5, %v562_v6 }
 0x360   : > { %566 = vst [vmem:[%s320_s8] sm:$0xff] %v563_v7 }
 0x361   : > { %1096 = shalt.err (!%p1093_p3)
}
 0x362   : > { %844 = dma.vmem_to_hbm [thread:$0]  (%p1267_p13), %s587_s14, 128, %s589_s17, %s569_s28  }
 0x365   : > { %v564_v8 = vpop.f32.mrf.mxu1 }
 0x366 PF: > { %s614_s12 = sand.u32 1, %s1135_s21   ;;  %p1389_p5 = scmp.ge.s32.totalorder %s1147_s24, 2 }
 0x367   : > { %s615_s25 = scalar_lea.sflag [#allocation4], %s614_s12 }
 0x368   : > { %p863_p12 = pnand %p1389_p5, %p1272_p4 }
 0x36a   : > { %p864_p8 = pneg %p863_p12 }
 0x36c   : > { %1126 = dma.done.wait (%p864_p8), %s615_s25, 128  }
 0x36d   : > { %1128 = vsyncadd (%p864_p8), %s615_s25, 4294967168  ;;  %s625_s26 = scalar_lea.sflag [#allocation12], %s614_s12 }
 0x36e   : > { %1130 = dma.done.wait (%p864_p8), %s625_s26, 128  }
 0x36f   : > { %1132 = vsyncadd (%p864_p8), %s625_s26, 4294967168  ;;  %p25_p13 = scmp.ge.s32.totalorder %s1247_s27, 4   ;;  %s1390_s21 = smov %s1139_s22 }
 0x370   : > { %s1391_s22 = smov %s1143_s23  ;;  %s1392_s23 = smov %s1259_s9 }
 0x371   : > { %s1393_s24 = smov %s1247_s27  ;;  %27 = sbr.rel (!%p25_p13) target bundleno = 9 (0x9), region = 114 }
 0x376   :  { %631 = vsyncpa [#allocation3], 1 }
 0x377   :  { %633 = vsyncpa [#allocation3 + $0x1], 1 }
 0x378   :  { %634 = vsyncpa [#allocation6], 1 }
 0x379   :  { %635 = vsyncpa [#allocation9], 1 }
 0x37a   :  { %636 = vsyncpa [#allocation4], 1 }
 0x37b   :  { %638 = vsyncpa [#allocation4 + $0x1], 1 }
 0x37c   :  { %639 = vsyncpa [#allocation12], 1 }
 0x37d   :  { %641 = vsyncpa [#allocation12 + $0x1], 1 }

</bundles_post_ra>
